<compile_context>
chip_gen: v6e
topology: v6e:2x2x1
jax: 0.10.0
libtpu: 0.0.40
codegen_flags: <defaults>
</compile_context>

<pallas_src>
import math

import jax
import jax.numpy as jnp
from jax.experimental import pallas as pl
from jax.experimental.pallas import tpu as pltpu


def post_smooth_kernel(x_ref, scale_ref, o_ref):
    # x_ref / o_ref: (1, TS, Dp) tile; scale_ref: (1, 1, Dp) lane-packed scale.
    o_ref[...] = x_ref[...] * scale_ref[...]


def _vmem_budgets():
    """(max_tile_bytes, vmem_limit_bytes) per TPU generation."""
    tile_budget, vmem_limit = 8 << 20, 48 << 20        # safe on v7x (64 MiB VMEM)
    try:
        cap = getattr(pltpu.get_tpu_info(), "vmem_capacity_bytes", None)
        if cap is not None and cap >= (96 << 20):       # v5e / v6e: 128 MiB VMEM
            tile_budget, vmem_limit = 16 << 20, 96 << 20
    except Exception:
        pass
    return tile_budget, vmem_limit


def _pick_tile_rows(sp, dp, itemsize, max_tile_bytes):
    """Largest sublane-aligned divisor of sp whose (rows, dp) tile fits budget."""
    sub = {4: 8, 2: 16, 1: 32}.get(itemsize, 8)         # packed-sublane alignment
    bytes_per_row = max(dp * itemsize, 1)
    max_rows = max(1, max_tile_bytes // bytes_per_row)
    if sp <= max_rows:
        return sp                                        # full axis: always legal
    best = None
    limit = (max_rows // sub) * sub
    for cand in range(sub, limit + 1, sub):              # trace-time only
        if sp % cand == 0:
            best = cand
    if best is not None:
        return best
    # No aligned divisor fits: aligned non-divisor tile (Pallas masks the
    # ragged last block).  Only reachable for pathological Sp.
    return max(sub, limit)


def post_smooth(x, smooth, top_k_indices):
    """Pallas implementation of PostSmoothLayer.forward.

    x:             (B, H, S, D)
    smooth:        (N,) with N = 2 * hidden_dim * top_k
    top_k_indices: (N,) int32 indices into the flattened H*D channel axis
    """
    B, H, S, D = x.shape
    max_tile_bytes, vmem_limit = _vmem_budgets()

    # Fold the indexed gather/multiply/scatter into a dense per-channel scale.
    # NOTE: with duplicate indices the winning write is unspecified — same as
    # PyTorch's indexed assignment with duplicates.  The multiply stays in
    # x.dtype (bf16*bf16), matching the module's bf16 buffers.
    scale_flat = jnp.ones((H * D,), dtype=x.dtype).at[top_k_indices].set(
        smooth.astype(x.dtype))
    scale = scale_flat.reshape(H, D)

    # Lane-dense packing: fold k consecutive S rows into the lane axis so the
    # packed last dim Dp is a multiple of 128 (unmasked vst).  Pure reshape of
    # the contiguous (S, D) tail — no transpose.
    k = 128 // math.gcd(D, 128)
    if S % k != 0:
        k = 1                                            # fallback: masked stores
    Sp, Dp = S // k, D * k

    # Flatten B*H into the leading grid axis: each tile DMA is one contiguous
    # HBM stretch and the grid has enough points to feed both v7x cores.
    xp = x.reshape(B * H, Sp, Dp)
    scale_p = jnp.tile(scale, (1, k)).reshape(H, 1, Dp)  # lane r*D+d -> scale[h, d]

    ts = _pick_tile_rows(Sp, Dp, x.dtype.itemsize, max_tile_bytes)
    grid = (B * H, pl.cdiv(Sp, ts))

    out = pl.pallas_call(
        post_smooth_kernel,
        out_shape=jax.ShapeDtypeStruct((B * H, Sp, Dp), x.dtype),
        grid=grid,
        in_specs=[
            pl.BlockSpec((1, ts, Dp), lambda bh, s: (bh, s, 0)),
            pl.BlockSpec((1, 1, Dp), lambda bh, s: (bh % H, 0, 0)),
        ],
        out_specs=pl.BlockSpec((1, ts, Dp), lambda bh, s: (bh, s, 0)),
        input_output_aliases={0: 0},
        compiler_params=pltpu.CompilerParams(
            dimension_semantics=("parallel", "parallel"),
            vmem_limit_bytes=vmem_limit),
    )(xp, scale_p)

    return out.reshape(B, H, S, D)


def post_smooth_ref(x, smooth, top_k_indices):
    """Pure-JAX reference that mirrors the PyTorch forward literally."""
    B, H, S, D = x.shape
    xf = jnp.transpose(x, (0, 2, 1, 3)).reshape(B, S, H * D)
    vals = xf[:, :, top_k_indices] * smooth.astype(x.dtype)
    xf = xf.at[:, :, top_k_indices].set(vals)
    return jnp.transpose(xf.reshape(B, S, H, D), (0, 2, 1, 3))


if __name__ == "__main__":
    # Small shapes consistent with the module: x is (B, H, S, D);
    # smooth / top_k_indices have length 2 * hidden_dim * top_k and index
    # into the flattened H*D channel axis.
    B, H, S, D = 2, 4, 8, 32
    hidden_dim, top_k = 16, 2
    N = 2 * hidden_dim * top_k           # 64 indexed channels out of H*D = 128

    key = jax.random.PRNGKey(0)
    kx, ks, ki = jax.random.split(key, 3)

    x = jax.random.normal(kx, (B, H, S, D), dtype=jnp.float32).astype(jnp.bfloat16)
    smooth = (0.5 + jax.random.uniform(ks, (N,), dtype=jnp.float32)).astype(jnp.bfloat16)
    # Unique indices (a permutation prefix) so the scatter semantics are
    # well-defined regardless of duplicate-write ordering.
    top_k_indices = jax.random.permutation(ki, H * D)[:N].astype(jnp.int32)

    # Compute reference first (the kernel output may alias a copy of its input).
    ref = jax.block_until_ready(post_smooth_ref(x, smooth, top_k_indices))

    out = post_smooth(x, smooth, top_k_indices)
    out = jax.block_until_ready(out)

    assert out.shape == x.shape and out.dtype == x.dtype
    assert jnp.allclose(out.astype(jnp.float32), ref.astype(jnp.float32),
                        atol=1e-2, rtol=1e-2), "mismatch vs reference"
    print("KERNEL_OK")
</pallas_src>

<mosaic_0001>
module attributes {stable_mosaic.version = 11 : i64} {
  func.func @post_smooth_kernel(%arg0: i32, %arg1: i32, %arg2: memref<1x2x128xbf16, #tpu.memory_space<vmem>>, %arg3: memref<1x1x128xbf16, #tpu.memory_space<vmem>>, %arg4: memref<1x2x128xbf16, #tpu.memory_space<vmem>>) attributes {dimension_semantics = [#tpu.dimension_semantics<parallel>, #tpu.dimension_semantics<parallel>], iteration_bounds = array<i64: 8, 1>, scalar_prefetch = 0 : i64, scratch_operands = 0 : i64, tpu.core_type = #tpu.core_type<tc>, window_params = [{transform_indices = @transform_0, window_bounds = array<i64: 1, 2, 128>}, {transform_indices = @transform_1, window_bounds = array<i64: 1, 1, 128>}, {transform_indices = @transform_2, window_bounds = array<i64: 1, 2, 128>}]} {
    %c0 = arith.constant 0 : index
    %c0_0 = arith.constant 0 : index
    %c0_1 = arith.constant 0 : index
    %0 = vector.load %arg2[%c0, %c0_0, %c0_1] : memref<1x2x128xbf16, #tpu.memory_space<vmem>>, vector<1x2x128xbf16>
    %c0_2 = arith.constant 0 : index
    %c0_3 = arith.constant 0 : index
    %c0_4 = arith.constant 0 : index
    %1 = vector.load %arg3[%c0_2, %c0_3, %c0_4] : memref<1x1x128xbf16, #tpu.memory_space<vmem>>, vector<1x1x128xbf16>
    %2 = vector.broadcast %1 : vector<1x1x128xbf16> to vector<1x2x128xbf16>
    %3 = arith.mulf %0, %2 : vector<1x2x128xbf16>
    %c0_5 = arith.constant 0 : index
    %c0_6 = arith.constant 0 : index
    %c0_7 = arith.constant 0 : index
    %4 = vector.load %arg4[%c0_5, %c0_6, %c0_7] : memref<1x2x128xbf16, #tpu.memory_space<vmem>>, vector<1x2x128xbf16>
    tpu.vector_store %arg4[%c0_5, %c0_6, %c0_7], %3 {strides = array<i32>} : memref<1x2x128xbf16, #tpu.memory_space<vmem>>, vector<1x2x128xbf16>,
    return
  }
  func.func @transform_0(%arg0: i32, %arg1: i32) -> (i32, i32, i32) {
    %c0_i32 = arith.constant 0 : i32
    %c0_i32_0 = arith.constant 0 : i32
    return %arg0, %arg1, %c0_i32 : i32, i32, i32
  }
  func.func @transform_1(%arg0: i32, %arg1: i32) -> (i32, i32, i32) {
    %c4_i32 = arith.constant 4 : i32
    %c0_i32 = arith.constant 0 : i32
    %0 = arith.cmpi eq, %c4_i32, %c0_i32 : i32
    %c1_i32 = arith.constant 1 : i32
    %1 = arith.select %0, %c1_i32, %c4_i32 : i32
    %2 = arith.remsi %arg0, %1 : i32
    %c0_i32_0 = arith.constant 0 : i32
    %3 = arith.cmpi ne, %2, %c0_i32_0 : i32
    %c0_i32_1 = arith.constant 0 : i32
    %4 = arith.cmpi slt, %2, %c0_i32_1 : i32
    %c0_i32_2 = arith.constant 0 : i32
    %5 = arith.cmpi slt, %1, %c0_i32_2 : i32
    %6 = arith.xori %4, %5 : i1
    %7 = arith.andi %6, %3 : i1
    %8 = arith.addi %2, %1 : i32
    %9 = arith.select %7, %8, %2 : i32
    %c0_i32_3 = arith.constant 0 : i32
    %c0_i32_4 = arith.constant 0 : i32
    %c0_i32_5 = arith.constant 0 : i32
    return %9, %c0_i32_3, %c0_i32_4 : i32, i32, i32
  }
  func.func @transform_2(%arg0: i32, %arg1: i32) -> (i32, i32, i32) {
    %c0_i32 = arith.constant 0 : i32
    %c0_i32_0 = arith.constant 0 : i32
    return %arg0, %arg1, %c0_i32 : i32, i32, i32
  }
}

</mosaic_0001>

<bundles_post_ra>
// kernel: tpu_custom_call.1
= control target key start
LH: loop header
LB: loop body
LE: loop exit
PB: predicated region body
PF: predicated region fallthrough
CT: control target
= control target key end

     0   :  { %7 = vsyncpa [#allocation3], 0  ;;  %s729_s0 = inlined_call_operand.hbm [shape: bf16[8,2,128], index: 0, kind: input, shape index: {}, may-alias: {0,2}]   ;;  %s730_s1 = inlined_call_operand.vmem [shape: bf16[4,1,128], index: 1, kind: input, shape index: {}]   ;;  %s731_s2 = inlined_call_operand.hbm [shape: bf16[8,2,128], index: 2, kind: output, shape index: {}, may-alias: {0,2}]  }
   0x1   :  { %9 = vsyncpa [#allocation3 + $0x1], 0 }
   0x2   :  { %10 = vsyncpa [#allocation4], 0 }
   0x3   :  { %12 = vsyncpa [#allocation4 + $0x1], 0  ;;  %s584_s9 = smov 0   ;;  %s586_s10 = smov 0  }
   0x4   :  { %s588_s11 = smov 0   ;;  %s590_s12 = smov 0  }
   0x5   :  { %s592_s13 = smov 0   ;;  %s594_s14 = smov 0  }
   0x6 LB: > { %s377_s15 = sadd.s32 4294967295, %s565_s14   ;;  %s378_s16 = sadd.s32 4294967294, %s565_s14   ;;  %s565_s14 = sphi %s594_s14, %s18_s14   ;;  %s561_s13 = sphi %s592_s13, %s742_s13   ;;  %s557_s12 = sphi %s590_s12, %s741_s12   ;;  %s553_s11 = sphi %s588_s11, %s740_s11   ;;  %s549_s10 = sphi %s586_s10, %s739_s10   ;;  %s545_s9 = sphi %s584_s9, %s738_s9  }
   0x7   : > { %s30_s17 = sadd.s32 1, %s561_s13  ;;  %s39_s18 = sadd.s32 1, %s553_s11 }
   0x8   : > { %p32_p0 = scmp.ge.s32.totalorder %s30_s17, 8  ;;  %p46_p1 = scmp.ne.s32.totalorder %s553_s11, %s549_s10 }
   0x9   : > { %p47_p2 = scmp.eq.s32.totalorder %s565_s14, 0  ;;  %p52_p3 = scmp.ne.s32.totalorder %s549_s10, %s545_s9 }
   0xa   : > { %s744_s17 = smov (%p32_p0, %s30_s17), 0  ;;  %p53_p5 = scmp.eq.s32.totalorder %s377_s15, 0 }
   0xb   : > { %p625_p4 = por %p47_p2, %p46_p1  ;;  %s34_s20 = ssub.s32 %s561_s13, %s744_s17 }
   0xc   : > { %p128_p6 = scmp.eq.s32.totalorder %s377_s15, 7  ;;  %p37_p7 = scmp.eq.s32.totalorder %s34_s20, 0 }
   0xd   : > { %p631_p8 = por %p53_p5, %p52_p3  ;;  %p134_p10 = scmp.eq.s32.totalorder %s378_s16, 7 }
   0xe   : > { %p635_p9 = por %p128_p6, %p46_p1  ;;  %p407_p12 = scmp.lt.s32.totalorder %s565_s14, 8 }
   0xf   : > { %s640_s23 = scalar_select %p37_p7, %s553_s11, %s39_s18  }
  0x10   : > { %p642_p11 = por %p134_p10, %p52_p3  ;;  %s154_s25 = sand.u32 1, %s553_s11  }
  0x11   : > { %s387_s26 = sshll.u32 %s561_s13, 4  ;;  %s157_s27 = scalar_lea.vmem [#allocation2], %s154_s25 }
  0x12   : > { %s735_s24 = scalar_select %p642_p11, 1, 0 }
  0x13   : > { %s165_s28 = sshll.u32 %s157_s27, 4  ;;  %s163_s3 = scalar_lea.hbm %s729_s0, %s387_s26  ;;  %s166_s28 = int_to_ptr.vmem [resolvable:$true] %s165_s28 }
  0x14   : > { %p654_p13 = pnand %p407_p12, %p625_p4  ;;  %p388_p0 = scmp.ge.s32.totalorder %s565_s14, 1 }
  0x15   : > { %p200_p1 = scmp.lt.s32.totalorder %s565_s14, 9  ;;  %s155_s5 = scalar_lea.sflag [#allocation3], %s154_s25 }
  0x16   : > { %p459_p2 = pneg %p654_p13  ;;  %s470_s6 = scalar_lea.vmem %s166_s28, 16 }
  0x17   : > { %p471_p3 = scmp.ne.s32.totalorder %s166_s28, %s470_s6  ;;  %s567_s7 = smov [#allocation2]  }
  0x18   : > { %s475_s8 = sshll.u32 %s567_s7, 4  ;;  %s476_s8 = int_to_ptr.vmem [resolvable:$false] %s475_s8 }
  0x19   : > { %p473_p5 = pnand %p471_p3, %p459_p2  ;;  %s477_s15 = scalar_lea.vmem %s476_s8, 32 }
  0x1a   : > { %p478_p7 = scmp.lt.s32.totalorder %s166_s28, %s476_s8  ;;  %p479_p10 = scmp.lt.s32.totalorder %s477_s15, %s470_s6 }
  0x1b   : > { %p474_p6 = pneg %p473_p5 }
  0x1c   : > { %p480_p4 = por %p479_p10, %p478_p7 }
  0x1e   : > { %p481_p12 = pnand %p480_p4, %p474_p6 }
  0x20   : > { %484 = shalt.err (!%p481_p12)
}
  0x21   : > { %402 = dma.hbm_to_vmem [thread:$0]  (!%p654_p13), %s163_s3, 16, %s166_s28, %s155_s5  }
  0x22   : > { %p201_p11 = pnand %p388_p0, %p200_p1 }
  0x23   : > { %s669_s16 = sand.u32 (!%p201_p11), 1, %s549_s10  }
  0x24   : > { %204 = sbr.rel (%p201_p11) target bundleno = 74 (0x4a), region = 28  ;;  %s207_s18 = scalar_lea.sflag (!%p201_p11), [#allocation3], %s669_s16 }
  0x25   : > { %s209_s19 = scalar_lea.vmem (!%p201_p11), [#allocation2], %s669_s16 }
  0x29   : > { %536 = dma.done.wait (%p631_p8), %s207_s18, 16  }
  0x2a   : > { %538 = vsyncadd (%p631_p8), %s207_s18, 4294967280  ;;  %p243_p13 = scmp.lt.s32.totalorder %s557_s12, 0  ;;  %s244_s20 = ssub.s32 0, %s557_s12  ;;  %v275_v0 = vlaneseq  ;;  %v270_v5 = vld [vmem:[%s209_s19] sm:$0x1] }
  0x2b   : > { %s389_s25 = smin.u32 %s557_s12, %s244_s20  ;;  %s242_s3 = scalar_lea.vmem [#allocation5], %s669_s16 }
  0x2c   : > { %s246_s26 = sand.u32 3, %s389_s25   ;;  %v276_v1 = vshrl.u32 %v275_v0, 7  ;;  %s295_s4 = sshll.u32 %s242_s3, 4  ;;  %s685_s4 = int_to_ptr.vmem [resolvable:$true] %s295_s4 }
  0x2d   : > { %s247_s27 = ssub.s32 0, %s246_s26  ;;  %s392_s5 = sshll.u32 %s557_s12, 4 }
  0x2e   : > { %s746_s27 = smov (!%p243_p13, %s247_s27), %s246_s26  ;;  %v277_v2 = vsub.s32 0, %v276_v1  ;;  %s293_s8 = scalar_lea.hbm %s731_s2, %s392_s5 }
  0x2f   : > { %p391_p11 = scmp.lt.s32.totalorder %s746_s27, 0  ;;  %s253_s28 = sadd.s32 4, %s746_s27 }
  0x30   : > { %s282_s15 = scalar_lea.sflag [#allocation4], %s669_s16  ;;  %s485_s18 = scalar_lea.vmem %s685_s4, 16 }
  0x31   : > { %s748_s28 = smov (!%p391_p11, %s253_s28), %s746_s27  ;;  %p486_p8 = scmp.ne.s32.totalorder %s685_s4, %s485_s18 }
  0x32   : > { %p255_p0 = scmp.lt.s32.totalorder %s748_s28, 3  ;;  %s568_s19 = smov [#allocation5]  }
  0x33   : > { %p487_p1 = pnand %p486_p8, %p635_p9  ;;  %s489_s12 = sshll.u32 %s568_s19, 4  ;;  %s490_s12 = int_to_ptr.vmem [resolvable:$false] %s489_s12 }
  0x34   : > { %s750_s28 = smov (!%p255_p0, %s748_s28), 3  ;;  %s491_s20 = scalar_lea.vmem %s490_s12, 32 }
  0x35   : > { %s257_s30 = scalar_lea.vmem %s730_s1, %s750_s28  ;;  %p488_p2 = pneg %p487_p1 }
  0x36   : > { %v271_v3 = vld [vmem:[%s257_s30] sm:$0x1]  ;;  %p492_p3 = scmp.lt.s32.totalorder %s685_s4, %s490_s12  ;;  %p493_p5 = scmp.lt.s32.totalorder %s491_s20, %s485_s18 }
  0x37   : > { %v273_v4 = vpack.i.b16 %v271_v3, %v271_v3 }
  0x38   : > { %p494_p6 = por %p493_p5, %p492_p3 }
  0x39   : > { %v278_v6 = vrot.slane %v273_v4, %v277_v2 }
  0x3a   : > { %p495_p7 = pnand %p494_p6, %p488_p2 }
  0x3b   : > { %v279_v7 = vmul.bf16 %v278_v6, %v270_v5 }
  0x3d   : > { %280 = vst [vmem:[%s242_s3] sm:$0x1] %v279_v7 }
  0x3e   : > { %498 = shalt.err (!%p495_p7)
}
  0x3f   : > { %s499_s25 = scalar_lea.hbm %s293_s8, 16  ;;  %s503_s27 = scalar_lea.hbm %s731_s2, 128 }
  0x40   : > { %p500_p10 = scmp.ne.s32.totalorder %s293_s8, %s499_s25  ;;  %p504_p13 = scmp.lt.s32.totalorder %s293_s8, %s731_s2 }
  0x41   : > { %p505_p11 = scmp.lt.s32.totalorder %s503_s27, %s499_s25 }
  0x42   : > { %p501_p4 = pnand %p500_p10, %p635_p9 }
  0x43   : > { %p506_p0 = por %p505_p11, %p504_p13 }
  0x44   : > { %p502_p12 = pneg %p501_p4 }
  0x46   : > { %p507_p8 = pnand %p506_p0, %p502_p12 }
  0x48   : > { %510 = shalt.err (!%p507_p8)
}
  0x49   : > { %397 = dma.vmem_to_hbm [thread:$0]  (%p635_p9), %s685_s4, 16, %s293_s8, %s282_s15  }
  0x4a PF: > { %p408_p1 = scmp.ge.s32.totalorder %s565_s14, 2  ;;  %s307_s29 = sand.u32 1, %s545_s9  }
  0x4b   : > { %p737_p2 = scmp.ne.s32.totalorder %s735_s24, 0  ;;  %s308_s30 = scalar_lea.sflag [#allocation4], %s307_s29 }
  0x4d   : > { %p404_p3 = pnand %p408_p1, %p737_p2 }
  0x4f   : > { %p405_p5 = pneg %p404_p3 }
  0x51   : > { %540 = dma.done.wait (%p405_p5), %s308_s30, 16  }
  0x52   : > { %542 = vsyncadd (%p405_p5), %s308_s30, 4294967280  ;;  %s18_s14 = sadd.s32 1, %s565_s14   ;;  %s738_s9 = smov %s549_s10 }
  0x53   : > { %p15_p6 = scmp.ge.s32.totalorder %s18_s14, 10   ;;  %s739_s10 = smov %s553_s11 }
  0x54   : > { %s740_s11 = smov %s640_s23  ;;  %s741_s12 = smov %s561_s13 }
  0x55   : > { %s742_s13 = smov %s744_s17  ;;  %17 = sbr.rel (!%p15_p6) target bundleno = 6 (0x6), region = 76 }
  0x5a   :  { %312 = vsyncpa [#allocation3], 1 }
  0x5b   :  { %314 = vsyncpa [#allocation3 + $0x1], 1 }
  0x5c   :  { %315 = vsyncpa [#allocation4], 1 }
  0x5d   :  { %317 = vsyncpa [#allocation4 + $0x1], 1 }

</bundles_post_ra>
